<compile_context>
chip_gen: v7x
topology: tpu7x:2x2x1
jax: 0.10.0
libtpu: 0.0.40
codegen_flags: <defaults>
</compile_context>

<pallas_src>
import functools

import jax
import jax.numpy as jnp
from jax.experimental import pallas as pl
from jax.experimental.pallas import tpu as pltpu

EPSILON = 0.0001
LANE = 128
SUBLANE = 8


def _cdiv(a, b):
    return -(-a // b)


def _round_up(a, b):
    return _cdiv(a, b) * b


def _default_block_rows():
    # ~2 MiB (f32) input blocks on v5e-and-older, ~4 MiB on v6e/v7x where the
    # faster HBM makes the fixed per-grid-step overhead relatively expensive.
    try:
        kind = jax.devices()[0].device_kind.lower()
    except Exception:
        return 4096
    if "v6" in kind or "v7" in kind:
        return 8192
    return 4096


def _dice_partial_kernel(t_ref, l_ref, inter_out, denom_out, *,
                         tr, rows, cps, needs_mask):
    ri = pl.program_id(2)

    # Output blocks are resident across the reduction axis (their index ignores
    # ri); zero them at the start of each (batch, split) sequence.
    @pl.when(ri == 0)
    def _():
        inter_out[...] = jnp.zeros_like(inter_out)
        denom_out[...] = jnp.zeros_like(denom_out)

    t = t_ref[0].astype(jnp.float32)   # (tr, 128); widen in-VMEM, not in HBM
    cmp = l_ref[0] > 0.5               # single compare, reused twice

    def accumulate(t_v, cmp_v):
        l_bin = jnp.where(cmp_v, jnp.float32(1.0), jnp.float32(0.0))
        inter = jnp.where(cmp_v, t_v, jnp.float32(0.0))   # (l>0.5)*t w/o the mul
        denom = l_bin + t_v                               # merged denominator
        # Fold tr rows into the resident (8,128) output block: pure VALU adds,
        # no cross-lane/XLU reduction in the hot loop.
        # TODO(synk): confirm in the Mosaic dump that this reshape is
        # layout-free (it matches the native (8,128) tile); if a VMEM copy
        # materializes, switch to unrolled `acc += x[pl.ds(i*8, 8), :]` adds.
        inter_out[0, 0] += jnp.sum(
            inter.reshape(tr // SUBLANE, SUBLANE, LANE), axis=0)
        denom_out[0, 0] += jnp.sum(
            denom.reshape(tr // SUBLANE, SUBLANE, LANE), axis=0)

    if needs_mask:
        # Un-clamped global chunk id; slots past the valid range (or covering
        # the ragged tail) mask out-of-bounds rows so garbage in the partially
        # DMA'd boundary block never reaches the accumulators.
        gchunk = pl.program_id(1) * cps + ri
        row_start = gchunk * tr
        is_ragged = row_start + tr > rows

        @pl.when(jnp.logical_not(is_ragged))
        def _():
            accumulate(t, cmp)

        @pl.when(is_ragged)
        def _():
            rid = jax.lax.broadcasted_iota(jnp.int32, (tr, LANE), 0) + row_start
            valid = rid < rows
            accumulate(jnp.where(valid, t, jnp.float32(0.0)),
                       jnp.logical_and(cmp, valid))
    else:
        accumulate(t, cmp)


def dice_coefficient(targets, logits, *, block_rows=None, epsilon=EPSILON):
    """Dice coefficient matching the torch module. targets/logits: (B, ...)."""
    assert targets.shape == logits.shape
    if block_rows is None:
        block_rows = _default_block_rows()

    b = targets.shape[0]
    t2 = targets.reshape(b, -1)
    l2 = logits.reshape(b, -1)
    n = t2.shape[1]

    # Lane-dense layout: each batch row becomes (rows, 128). Only the (rare)
    # ragged lane tail is padded; zero padding is exact because 0 > 0.5 is
    # False and padded targets contribute 0.
    rows = _cdiv(n, LANE)
    if rows * LANE != n:
        pad = rows * LANE - n
        t2 = jnp.pad(t2, ((0, 0), (0, pad)))
        l2 = jnp.pad(l2, ((0, 0), (0, pad)))

    # Balanced chunking: pick the chunk count, then the smallest 8-aligned
    # chunk size that covers `rows` (last chunk wastes < 8 rows, masked).
    chunks = _cdiv(rows, block_rows)
    tr = _round_up(_cdiv(rows, chunks), SUBLANE)
    if tr > rows:                        # only possible for small inputs
        if rows >= SUBLANE:
            tr = (rows // SUBLANE) * SUBLANE   # ragged tail handled by mask
        else:
            # Tiny input (< 8 rows): pad up to one full (8,128) block.
            t2 = jnp.pad(t2, ((0, 0), (0, (SUBLANE - rows) * LANE)))
            l2 = jnp.pad(l2, ((0, 0), (0, (SUBLANE - rows) * LANE)))
            rows = SUBLANE
            tr = SUBLANE
    chunks = _cdiv(rows, tr)

    t3 = t2.reshape(b, rows, LANE)
    l3 = l2.reshape(b, rows, LANE)

    # Core-split axis: both v7x TensorCores get work even when b == 1.
    nsplit = 2 if chunks >= 2 else 1
    cps = _cdiv(chunks, nsplit)
    # If every (split, chunk) slot is completely full, skip mask codegen.
    needs_mask = (nsplit * cps * tr) != rows

    def in_map(bi, si, ri):
        # Clamp so over-allocated slots (nsplit*cps > chunks) re-read the last
        # valid chunk; the kernel masks their contribution to zero.
        return (bi, jnp.minimum(si * cps + ri, chunks - 1), 0)

    kernel = functools.partial(_dice_partial_kernel, tr=tr, rows=rows, cps=cps,
                               needs_mask=needs_mask)

    in_block_bytes = tr * LANE * (t3.dtype.itemsize + l3.dtype.itemsize)
    vmem_limit = int(min(max(2 * in_block_bytes + (8 << 20), 16 << 20), 56 << 20))

    inter_part, denom_part = pl.pallas_call(
        kernel,
        out_shape=(
            jax.ShapeDtypeStruct((b, nsplit, SUBLANE, LANE), jnp.float32),
            jax.ShapeDtypeStruct((b, nsplit, SUBLANE, LANE), jnp.float32),
        ),
        grid_spec=pltpu.PrefetchScalarGridSpec(
            num_scalar_prefetch=0,
            grid=(b, nsplit, cps),
            in_specs=[
                pl.BlockSpec((1, tr, LANE), in_map),
                pl.BlockSpec((1, tr, LANE), in_map),
            ],
            out_specs=(
                pl.BlockSpec((1, 1, SUBLANE, LANE),
                             lambda bi, si, ri: (bi, si, 0, 0)),
                pl.BlockSpec((1, 1, SUBLANE, LANE),
                             lambda bi, si, ri: (bi, si, 0, 0)),
            ),
        ),
        compiler_params=pltpu.CompilerParams(
            dimension_semantics=("parallel", "parallel", "arbitrary"),
            vmem_limit_bytes=vmem_limit,
        ),
    )(t3, l3)

    # Tiny finalize in JAX: reduce the (B, nsplit, 8, 128) lane/sublane
    # partials, then dice + batch mean.
    inter = inter_part.reshape(b, -1).sum(axis=-1)
    denom = denom_part.reshape(b, -1).sum(axis=-1)
    dice = (2.0 * inter + epsilon) / (denom + epsilon)
    return jnp.mean(dice)


def _reference(targets, logits, eps=EPSILON):
    b = targets.shape[0]
    l = (logits > 0.5).astype(jnp.float32).reshape(b, -1)
    t = targets.astype(jnp.float32).reshape(b, -1)
    inter = jnp.sum(l * t, axis=-1)
    dice = (2.0 * inter + eps) / (jnp.sum(l, axis=-1) + jnp.sum(t, axis=-1) + eps)
    return jnp.mean(dice)


if __name__ == "__main__":
    key = jax.random.PRNGKey(0)
    k1, k2, k3, k4 = jax.random.split(key, 4)

    # Small, module-consistent shapes: (B, C, H, W) = (2, 4, 16, 16).
    B, C, H, W = 2, 4, 16, 16
    targets = (jax.random.uniform(k1, (B, C, H, W)) > 0.5).astype(jnp.float32)
    logits = jax.random.uniform(k2, (B, C, H, W), dtype=jnp.float32)

    out = jax.block_until_ready(dice_coefficient(targets, logits))
    ref = _reference(targets, logits)
    assert jnp.allclose(out, ref, atol=1e-5, rtol=1e-5), (out, ref)

    # Exercise the ragged / multi-chunk / core-split / clamped-slot paths:
    # N not a multiple of 128, small forced block_rows, odd batch.
    B2, C2, H2, W2 = 3, 3, 37, 41
    targets2 = (jax.random.uniform(k3, (B2, C2, H2, W2)) > 0.5).astype(jnp.float32)
    logits2 = jax.random.uniform(k4, (B2, C2, H2, W2), dtype=jnp.float32)
    out2 = jax.block_until_ready(dice_coefficient(targets2, logits2, block_rows=8))
    ref2 = _reference(targets2, logits2)
    assert jnp.allclose(out2, ref2, atol=1e-5, rtol=1e-5), (out2, ref2)

    print("KERNEL_OK")
</pallas_src>

<mosaic_0001>
module attributes {stable_mosaic.version = 11 : i64} {
  func.func @_dice_partial_kernel(%arg0: i32, %arg1: i32, %arg2: i32, %arg3: memref<1x8x128xf32, #tpu.memory_space<vmem>>, %arg4: memref<1x8x128xf32, #tpu.memory_space<vmem>>, %arg5: memref<1x1x8x128xf32, #tpu.memory_space<vmem>>, %arg6: memref<1x1x8x128xf32, #tpu.memory_space<vmem>>) attributes {dimension_semantics = [#tpu.dimension_semantics<parallel>, #tpu.dimension_semantics<parallel>, #tpu.dimension_semantics<arbitrary>], iteration_bounds = array<i64: 2, 1, 1>, scalar_prefetch = 0 : i64, scratch_operands = 0 : i64, tpu.core_type = #tpu.core_type<tc>, window_params = [{transform_indices = @transform_0, window_bounds = array<i64: 1, 8, 128>}, {transform_indices = @transform_1, window_bounds = array<i64: 1, 8, 128>}, {transform_indices = @transform_2, window_bounds = array<i64: 1, 1, 8, 128>}, {transform_indices = @transform_3, window_bounds = array<i64: 1, 1, 8, 128>}]} {
    %c0_i32 = arith.constant 0 : i32
    %0 = arith.cmpi eq, %arg2, %c0_i32 : i32
    %1 = arith.extui %0 : i1 to i32
    %c0_i32_0 = arith.constant 0 : i32
    %2 = arith.cmpi ne, %1, %c0_i32_0 : i32
    scf.if %2 {
      %cst_27 = arith.constant 0.000000e+00 : f32
      %31 = vector.broadcast %cst_27 : f32 to vector<1x1x8x128xf32>
      %c0_28 = arith.constant 0 : index
      %c0_29 = arith.constant 0 : index
      %c0_30 = arith.constant 0 : index
      %c0_31 = arith.constant 0 : index
      %32 = vector.load %arg5[%c0_28, %c0_29, %c0_30, %c0_31] : memref<1x1x8x128xf32, #tpu.memory_space<vmem>>, vector<1x1x8x128xf32>
      tpu.vector_store %arg5[%c0_28, %c0_29, %c0_30, %c0_31], %31 {strides = array<i32>} : memref<1x1x8x128xf32, #tpu.memory_space<vmem>>, vector<1x1x8x128xf32>,
      %cst_32 = arith.constant 0.000000e+00 : f32
      %33 = vector.broadcast %cst_32 : f32 to vector<1x1x8x128xf32>
      %c0_33 = arith.constant 0 : index
      %c0_34 = arith.constant 0 : index
      %c0_35 = arith.constant 0 : index
      %c0_36 = arith.constant 0 : index
      %34 = vector.load %arg6[%c0_33, %c0_34, %c0_35, %c0_36] : memref<1x1x8x128xf32, #tpu.memory_space<vmem>>, vector<1x1x8x128xf32>
      tpu.vector_store %arg6[%c0_33, %c0_34, %c0_35, %c0_36], %33 {strides = array<i32>} : memref<1x1x8x128xf32, #tpu.memory_space<vmem>>, vector<1x1x8x128xf32>,
    } else {
    }
    %c0 = arith.constant 0 : index
    %c0_1 = arith.constant 0 : index
    %c0_2 = arith.constant 0 : index
    %3 = vector.load %arg3[%c0, %c0_1, %c0_2] : memref<1x8x128xf32, #tpu.memory_space<vmem>>, vector<1x8x128xf32>
    %4 = vector.shape_cast %3 : vector<1x8x128xf32> to vector<8x128xf32>
    %c0_3 = arith.constant 0 : index
    %c0_4 = arith.constant 0 : index
    %c0_5 = arith.constant 0 : index
    %5 = vector.load %arg4[%c0_3, %c0_4, %c0_5] : memref<1x8x128xf32, #tpu.memory_space<vmem>>, vector<1x8x128xf32>
    %6 = vector.shape_cast %5 : vector<1x8x128xf32> to vector<8x128xf32>
    %cst = arith.constant 5.000000e-01 : f32
    %7 = vector.broadcast %cst : f32 to vector<8x128xf32>
    %8 = arith.cmpf ogt, %6, %7 : vector<8x128xf32>
    %cst_6 = arith.constant 1.000000e+00 : f32
    %cst_7 = arith.constant 0.000000e+00 : f32
    %9 = vector.broadcast %cst_6 : f32 to vector<8x128xf32>
    %10 = vector.broadcast %cst_7 : f32 to vector<8x128xf32>
    %11 = arith.select %8, %9, %10 : vector<8x128xi1>, vector<8x128xf32>
    %cst_8 = arith.constant 0.000000e+00 : f32
    %12 = vector.broadcast %cst_8 : f32 to vector<8x128xf32>
    %13 = arith.select %8, %4, %12 : vector<8x128xi1>, vector<8x128xf32>
    %14 = arith.addf %11, %4 : vector<8x128xf32>
    %c0_9 = arith.constant 0 : index
    %c0_10 = arith.constant 0 : index
    %c0_11 = arith.constant 0 : index
    %c0_12 = arith.constant 0 : index
    %15 = vector.load %arg5[%c0_9, %c0_10, %c0_11, %c0_12] : memref<1x1x8x128xf32, #tpu.memory_space<vmem>>, vector<1x1x8x128xf32>
    %16 = vector.shape_cast %15 : vector<1x1x8x128xf32> to vector<8x128xf32>
    %17 = vector.shape_cast %13 : vector<8x128xf32> to vector<1x8x128xf32>
    %cst_13 = arith.constant dense<0.000000e+00> : vector<8x128xf32>
    %18 = vector.multi_reduction <add>, %17, %cst_13 [0] : vector<1x8x128xf32> to vector<8x128xf32>
    %19 = arith.addf %16, %18 : vector<8x128xf32>
    %c0_14 = arith.constant 0 : index
    %c0_15 = arith.constant 0 : index
    %c0_16 = arith.constant 0 : index
    %c0_17 = arith.constant 0 : index
    %20 = vector.load %arg5[%c0_14, %c0_15, %c0_16, %c0_17] : memref<1x1x8x128xf32, #tpu.memory_space<vmem>>, vector<1x1x8x128xf32>
    %21 = vector.shape_cast %20 : vector<1x1x8x128xf32> to vector<8x128xf32>
    %22 = vector.shape_cast %19 : vector<8x128xf32> to vector<1x1x8x128xf32>
    tpu.vector_store %arg5[%c0_14, %c0_15, %c0_16, %c0_17], %22 {strides = array<i32>} : memref<1x1x8x128xf32, #tpu.memory_space<vmem>>, vector<1x1x8x128xf32>,
    %c0_18 = arith.constant 0 : index
    %c0_19 = arith.constant 0 : index
    %c0_20 = arith.constant 0 : index
    %c0_21 = arith.constant 0 : index
    %23 = vector.load %arg6[%c0_18, %c0_19, %c0_20, %c0_21] : memref<1x1x8x128xf32, #tpu.memory_space<vmem>>, vector<1x1x8x128xf32>
    %24 = vector.shape_cast %23 : vector<1x1x8x128xf32> to vector<8x128xf32>
    %25 = vector.shape_cast %14 : vector<8x128xf32> to vector<1x8x128xf32>
    %cst_22 = arith.constant dense<0.000000e+00> : vector<8x128xf32>
    %26 = vector.multi_reduction <add>, %25, %cst_22 [0] : vector<1x8x128xf32> to vector<8x128xf32>
    %27 = arith.addf %24, %26 : vector<8x128xf32>
    %c0_23 = arith.constant 0 : index
    %c0_24 = arith.constant 0 : index
    %c0_25 = arith.constant 0 : index
    %c0_26 = arith.constant 0 : index
    %28 = vector.load %arg6[%c0_23, %c0_24, %c0_25, %c0_26] : memref<1x1x8x128xf32, #tpu.memory_space<vmem>>, vector<1x1x8x128xf32>
    %29 = vector.shape_cast %28 : vector<1x1x8x128xf32> to vector<8x128xf32>
    %30 = vector.shape_cast %27 : vector<8x128xf32> to vector<1x1x8x128xf32>
    tpu.vector_store %arg6[%c0_23, %c0_24, %c0_25, %c0_26], %30 {strides = array<i32>} : memref<1x1x8x128xf32, #tpu.memory_space<vmem>>, vector<1x1x8x128xf32>,
    return
  }
  func.func @transform_0(%arg0: i32, %arg1: i32, %arg2: i32) -> (i32, i32, i32) {
    %c1_i32 = arith.constant 1 : i32
    %0 = arith.muli %arg1, %c1_i32 : i32
    %1 = arith.addi %0, %arg2 : i32
    %c0_i32 = arith.constant 0 : i32
    %2 = arith.minsi %1, %c0_i32 : i32
    %c0_i32_0 = arith.constant 0 : i32
    %c0_i32_1 = arith.constant 0 : i32
    return %arg0, %2, %c0_i32_0 : i32, i32, i32
  }
  func.func @transform_1(%arg0: i32, %arg1: i32, %arg2: i32) -> (i32, i32, i32) {
    %c1_i32 = arith.constant 1 : i32
    %0 = arith.muli %arg1, %c1_i32 : i32
    %1 = arith.addi %0, %arg2 : i32
    %c0_i32 = arith.constant 0 : i32
    %2 = arith.minsi %1, %c0_i32 : i32
    %c0_i32_0 = arith.constant 0 : i32
    %c0_i32_1 = arith.constant 0 : i32
    return %arg0, %2, %c0_i32_0 : i32, i32, i32
  }
  func.func @transform_2(%arg0: i32, %arg1: i32, %arg2: i32) -> (i32, i32, i32, i32) {
    %c0_i32 = arith.constant 0 : i32
    %c0_i32_0 = arith.constant 0 : i32
    %c0_i32_1 = arith.constant 0 : i32
    return %arg0, %arg1, %c0_i32, %c0_i32_0 : i32, i32, i32, i32
  }
  func.func @transform_3(%arg0: i32, %arg1: i32, %arg2: i32) -> (i32, i32, i32, i32) {
    %c0_i32 = arith.constant 0 : i32
    %c0_i32_0 = arith.constant 0 : i32
    %c0_i32_1 = arith.constant 0 : i32
    return %arg0, %arg1, %c0_i32, %c0_i32_0 : i32, i32, i32, i32
  }
}

</mosaic_0001>

<bundles_post_ra>
// kernel: tpu_custom_call.1
= control target key start
LH: loop header
LB: loop body
LE: loop exit
PB: predicated region body
PF: predicated region fallthrough
CT: control target
= control target key end

     0   :  { %9 = vsyncpa [#allocation3], 0  ;;  %s1037_s0 = inlined_call_operand.hbm [shape: f32[2,8,128], index: 0, kind: input, shape index: {}]   ;;  %s1038_s1 = inlined_call_operand.hbm [shape: f32[2,8,128], index: 1, kind: input, shape index: {}]   ;;  %s1039_s2 = inlined_call_operand.hbm [shape: f32[2,1,8,128], index: 2, kind: output, shape index: {0}]   ;;  %s1040_s3 = inlined_call_operand.hbm [shape: f32[2,1,8,128], index: 3, kind: output, shape index: {1}]  }
   0x1   :  { %11 = vsyncpa [#allocation3 + $0x1], 0 }
   0x2   :  { %12 = vsyncpa [#allocation6], 0 }
   0x3   :  { %14 = vsyncpa [#allocation6 + $0x1], 0 }
   0x4   :  { %15 = vsyncpa [#allocation4], 0 }
   0x5   :  { %17 = vsyncpa [#allocation4 + $0x1], 0 }
   0x6   :  { %18 = vsyncpa [#allocation9], 0 }
   0x7   :  { %20 = vsyncpa [#allocation9 + $0x1], 0  ;;  %s778_s12 = smov 0   ;;  %s780_s13 = smov 0  }
   0x8   :  { %s782_s14 = smov 0   ;;  %s784_s15 = smov 0  }
   0x9   :  { %s786_s16 = smov 0   ;;  %s788_s17 = smov 0  }
   0xa LB: > { %s481_s18 = sadd.s32 4294967295, %s751_s17   ;;  %s482_s19 = sadd.s32 4294967294, %s751_s17   ;;  %s751_s17 = sphi %s788_s17, %s26_s17   ;;  %s747_s16 = sphi %s786_s16, %s1060_s16   ;;  %s743_s15 = sphi %s784_s15, %s1059_s15   ;;  %s739_s14 = sphi %s782_s14, %s1058_s14   ;;  %s735_s13 = sphi %s780_s13, %s1057_s13   ;;  %s731_s12 = sphi %s778_s12, %s1056_s12  }
   0xb   : > { %s45_s20 = sadd.s32 1, %s747_s16  ;;  %s60_s21 = sadd.s32 1, %s739_s14 }
   0xc   : > { %p47_p0 = scmp.ge.s32.totalorder %s45_s20, 2  ;;  %p67_p1 = scmp.ne.s32.totalorder %s739_s14, %s735_s13 }
   0xd   : > { %p68_p2 = scmp.eq.s32.totalorder %s751_s17, 0  ;;  %p73_p3 = scmp.ne.s32.totalorder %s735_s13, %s731_s12 }
   0xe   : > { %s1062_s20 = smov (%p47_p0, %s45_s20), 0  ;;  %p74_p5 = scmp.eq.s32.totalorder %s481_s18, 0 }
   0xf   : > { %p819_p4 = por %p68_p2, %p67_p1  ;;  %s55_s23 = ssub.s32 %s747_s16, %s1062_s20 }
  0x10   : > { %p133_p6 = scmp.eq.s32.totalorder %s481_s18, 1  ;;  %p58_p7 = scmp.eq.s32.totalorder %s55_s23, 0 }
  0x11   : > { %p825_p8 = por %p74_p5, %p73_p3  ;;  %p139_p10 = scmp.eq.s32.totalorder %s482_s19, 1 }
  0x12   : > { %p829_p9 = por %p133_p6, %p67_p1  ;;  %p522_p13 = scmp.lt.s32.totalorder %s751_s17, 2 }
  0x13   : > { %s1044_s24 = scalar_select %p825_p8, 1, 0 }
  0x14   : > { %s1045_s25 = scalar_select %p829_p9, 1, 0 }
  0x15   : > { %s834_s26 = scalar_select %p58_p7, %s739_s14, %s60_s21  }
  0x16   : > { %p836_p11 = por %p139_p10, %p73_p3  ;;  %s843_s28 = sand.u32 1, %s739_s14  }
  0x17   : > { %s485_s29 = sshll.u32 %s843_s28, 3  ;;  %s486_s30 = sshll.u32 %s747_s16, 7 }
  0x18   : > { %s1046_s27 = scalar_select %p836_p11, 1, 0 }
  0x19   : > { %s852_s6 = scalar_lea.hbm %s1037_s0, %s486_s30  ;;  %s191_s7 = scalar_lea.vmem [#allocation2], %s485_s29 }
  0x1a   : > { %s202_s8 = sshll.u32 %s191_s7, 4  ;;  %p860_p0 = pnand %p522_p13, %p819_p4  ;;  %s856_s8 = int_to_ptr.vmem [resolvable:$true] %s202_s8 }
  0x1b   : > { %s188_s10 = scalar_lea.sflag [#allocation3], %s843_s28  ;;  %s573_s11 = scalar_lea.hbm %s852_s6, 128 }
  0x1c   : > { %p574_p3 = scmp.ne.s32.totalorder %s852_s6, %s573_s11  ;;  %p575_p5 = pneg %p860_p0 }
  0x1d   : > { %s578_s21 = scalar_lea.hbm %s1037_s0, 256  ;;  %p579_p4 = scmp.lt.u32.totalorder %s852_s6, %s1037_s0 }
  0x1e   : > { %p576_p6 = pnand %p575_p5, %p574_p3  ;;  %p580_p10 = scmp.lt.u32.totalorder %s578_s21, %s573_s11 }
  0x1f   : > { %p582_p12 = scmp.lt.u32.totalorder %s573_s11, %s852_s6 }
  0x20   : > { %p577_p7 = pneg %p576_p6  ;;  %p581_p13 = por %p580_p10, %p579_p4 }
  0x22   : > { %p583_p1 = por %p582_p12, %p581_p13 }
  0x24   : > { %p584_p2 = pnand %p583_p1, %p577_p7 }
  0x26   : > { %587 = shalt.err (!%p584_p2)
}
  0x27   : > { %s588_s4 = scalar_lea.vmem %s856_s8, 128  ;;  %s753_s5 = smov [#allocation2]  }
  0x28   : > { %p589_p3 = scmp.ne.s32.totalorder %s856_s8, %s588_s4  ;;  %s593_s7 = sshll.u32 %s753_s5, 4  ;;  %s594_s7 = int_to_ptr.vmem [resolvable:$false] %s593_s7 }
  0x29   : > { %s595_s18 = scalar_lea.vmem %s594_s7, 256  ;;  %p596_p9 = scmp.lt.s32.totalorder %s856_s8, %s594_s7 }
  0x2a   : > { %p591_p6 = pnand %p589_p3, %p575_p5  ;;  %p597_p4 = scmp.lt.s32.totalorder %s595_s18, %s588_s4 }
  0x2c   : > { %p592_p11 = pneg %p591_p6  ;;  %p598_p10 = por %p597_p4, %p596_p9 }
  0x2e   : > { %p599_p12 = pnand %p598_p10, %p592_p11 }
  0x30   : > { %602 = shalt.err (!%p599_p12)
}
  0x31   : > { %511 = dma.hbm_to_vmem [thread:$0]  (!%p860_p0), %s852_s6, 128, %s856_s8, %s188_s10  }
  0x32   : > { %p1048_p1 = scmp.lt.s32.totalorder %s751_s17, 3  ;;  %p1049_p2 = scmp.ge.s32.totalorder %s751_s17, 1 }
  0x33   : > { %s905_s22 = scalar_lea.hbm %s1038_s1, %s486_s30  ;;  %s213_s23 = scalar_lea.vmem [#allocation5], %s485_s29 }
  0x34   : > { %p896_p7 = pnand %p1049_p2, %p1048_p1  ;;  %s224_s4 = sshll.u32 %s213_s23, 4  ;;  %s225_s4 = int_to_ptr.vmem [resolvable:$true] %s224_s4 }
  0x35   : > { %s210_s6 = scalar_lea.sflag [#allocation6], %s843_s28  ;;  %s603_s8 = scalar_lea.hbm %s905_s22, 128 }
  0x36   : > { %s1050_s11 = scalar_select %p896_p7, 1, 0 }
  0x37   : > { %p604_p9 = scmp.ne.s32.totalorder %s905_s22, %s603_s8  ;;  %s608_s30 = scalar_lea.hbm %s1038_s1, 256 }
  0x38   : > { %p609_p3 = scmp.lt.u32.totalorder %s905_s22, %s1038_s1  ;;  %p610_p6 = scmp.lt.u32.totalorder %s608_s30, %s603_s8 }
  0x39   : > { %p606_p11 = pnand %p604_p9, %p575_p5  ;;  %p612_p10 = scmp.lt.u32.totalorder %s603_s8, %s905_s22 }
  0x3a   : > { %p611_p4 = por %p610_p6, %p609_p3 }
  0x3b   : > { %p607_p13 = pneg %p606_p11 }
  0x3c   : > { %p613_p12 = por %p612_p10, %p611_p4 }
  0x3e   : > { %p614_p1 = pnand %p613_p12, %p607_p13 }
  0x40   : > { %617 = shalt.err (!%p614_p1)
}
  0x41   : > { %s618_s28 = scalar_lea.vmem %s225_s4, 128  ;;  %s754_s29 = smov [#allocation5]  }
  0x42   : > { %p619_p2 = scmp.ne.s32.totalorder %s225_s4, %s618_s28  ;;  %s623_s19 = sshll.u32 %s754_s29, 4  ;;  %s624_s19 = int_to_ptr.vmem [resolvable:$false] %s623_s19 }
  0x43   : > { %s625_s21 = scalar_lea.vmem %s624_s19, 256  ;;  %p626_p8 = scmp.lt.s32.totalorder %s225_s4, %s624_s19 }
  0x44   : > { %p621_p9 = pnand %p619_p2, %p575_p5  ;;  %p627_p7 = scmp.lt.s32.totalorder %s625_s21, %s618_s28 }
  0x46   : > { %p622_p11 = pneg %p621_p9  ;;  %p628_p3 = por %p627_p7, %p626_p8 }
  0x48   : > { %p629_p6 = pnand %p628_p3, %p622_p11 }
  0x4a   : > { %632 = shalt.err (!%p629_p6)
}
  0x4b   : > { %514 = dma.hbm_to_vmem [thread:$0]  (!%p860_p0), %s905_s22, 128, %s225_s4, %s210_s6  }
  0x4c   : > { %p1051_p13 = scmp.ne.s32.totalorder %s1050_s11, 0 }
  0x4d   : > { %s932_s23 = sand.u32 (!%p1051_p13), 1, %s735_s13   ;;  %p1052_p8 = scmp.ne.s32.totalorder (!%p1051_p13), %s1044_s24, 0 }
  0x4e   : > { %233 = sbr.rel (%p1051_p13) target bundleno = 138 (0x8a), region = 28  ;;  %s935_s8 = sshll.u32 (!%p1051_p13), %s932_s23, 3 }
  0x4f   : > { %s236_s10 = scalar_lea.sflag (!%p1051_p13), [#allocation3], %s932_s23  ;;  %s239_s5 = scalar_lea.vmem (!%p1051_p13), [#allocation2], %s935_s8 }
  0x55   : > { %714 = dma.done.wait (%p1052_p8), %s236_s10, 128  }
  0x56   : > { %716 = vsyncadd (%p1052_p8), %s236_s10, 4294967168  ;;  %s245_s9 = scalar_lea.sflag [#allocation6], %s932_s23  ;;  %s248_s11 = scalar_lea.vmem [#allocation5], %s935_s8 }
  0x57   : > { %718 = dma.done.wait (%p1052_p8), %s245_s9, 128  }
  0x58   : > { %720 = vsyncadd (%p1052_p8), %s245_s9, 4294967168  ;;  %v293_v0 = vld [vmem:[%s239_s5] sm:$0xff]  ;;  %v294_v1 = vld [vmem:[%s248_s11] sm:$0xff]  ;;  %s496_s22 = sshll.u32 %s743_s15, 7  ;;  %s273_s4 = scalar_lea.vmem [#allocation7], %s935_s8  ;;  %v755_v2 = vmov 0.0  }
  0x59   : > { %s327_s6 = sshll.u32 %s273_s4, 4  ;;  %vm295_vm0 = vcmp.gt.f32.partialorder %v294_v1, 0.5  ;;  %s280_s30 = scalar_lea.vmem [#allocation8], %s935_s8  ;;  %s959_s6 = int_to_ptr.vmem [resolvable:$true] %s327_s6 }
  0x5a   : > { %v296_v3 = vsel %vm295_vm0, 1.0, %v755_v2  ;;  %v297_v4 = vsel %vm295_vm0, %v293_v0, 0.0  ;;  %s341_s7 = sshll.u32 %s280_s30, 4  ;;  %s957_s28 = scalar_lea.hbm %s1039_s2, %s496_s22  ;;  %s966_s7 = int_to_ptr.vmem [resolvable:$true] %s341_s7 }
  0x5b   : > { %v298_v5 = vadd.f32 %v296_v3, %v293_v0  ;;  %302 = vst [vmem:[%s273_s4] sm:$0xff] %v297_v4  ;;  %s964_s19 = scalar_lea.hbm %s1040_s3, %s496_s22  ;;  %s308_s21 = scalar_lea.sflag [#allocation4], %s932_s23 }
  0x5c   : > { %s633_s10 = scalar_lea.vmem %s959_s6, 128  ;;  %p1053_p5 = scmp.ne.s32.totalorder %s1045_s25, 0 }
  0x5d   : > { %p634_p0 = scmp.ne.s32.totalorder %s959_s6, %s633_s10  ;;  %s756_s5 = smov [#allocation7]  }
  0x5e   : > { %s637_s9 = sshll.u32 %s756_s5, 4  ;;  %s638_s9 = int_to_ptr.vmem [resolvable:$false] %s637_s9 }
  0x5f   : > { %p635_p7 = pnand %p634_p0, %p1053_p5  ;;  %s639_s11 = scalar_lea.vmem %s638_s9, 256 }
  0x60   : > { %p640_p10 = scmp.lt.s32.totalorder %s959_s6, %s638_s9  ;;  %p641_p12 = scmp.lt.s32.totalorder %s639_s11, %s633_s10 }
  0x61   : > { %p636_p4 = pneg %p635_p7 }
  0x62   : > { %p642_p1 = por %p641_p12, %p640_p10 }
  0x64   : > { %p643_p2 = pnand %p642_p1, %p636_p4 }
  0x66   : > { %646 = shalt.err (!%p643_p2)
}
  0x67   : > { %s647_s22 = scalar_lea.hbm %s957_s28, 128  ;;  %s651_s18 = scalar_lea.hbm %s1039_s2, 256 }
  0x68   : > { %p648_p9 = scmp.ne.s32.totalorder %s957_s28, %s647_s22  ;;  %p652_p6 = scmp.lt.u32.totalorder %s957_s28, %s1039_s2 }
  0x69   : > { %p653_p13 = scmp.lt.u32.totalorder %s651_s18, %s647_s22  ;;  %p655_p0 = scmp.lt.u32.totalorder %s647_s22, %s957_s28 }
  0x6a   : > { %p649_p11 = pnand %p648_p9, %p1053_p5 }
  0x6b   : > { %p654_p8 = por %p653_p13, %p652_p6 }
  0x6c   : > { %p650_p3 = pneg %p649_p11 }
  0x6d   : > { %p656_p7 = por %p655_p0, %p654_p8 }
  0x6f   : > { %p657_p4 = pnand %p656_p7, %p650_p3 }
  0x71   : > { %660 = shalt.err (!%p657_p4)
}
  0x72   : > { %504 = dma.vmem_to_hbm [thread:$0]  (%p1053_p5), %s959_s6, 128, %s957_s28, %s308_s21   ;;  %306 = vst [vmem:[%s280_s30] sm:$0xff] %v298_v5 }
  0x73   : > { %s313_s10 = scalar_lea.sflag [#allocation9], %s932_s23  ;;  %s661_s5 = scalar_lea.vmem %s966_s7, 128 }
  0x74   : > { %p662_p10 = scmp.ne.s32.totalorder %s966_s7, %s661_s5  ;;  %s757_s9 = smov [#allocation8]  }
  0x75   : > { %s665_s11 = sshll.u32 %s757_s9, 4  ;;  %s666_s11 = int_to_ptr.vmem [resolvable:$false] %s665_s11 }
  0x76   : > { %p663_p12 = pnand %p662_p10, %p1053_p5  ;;  %s667_s22 = scalar_lea.vmem %s666_s11, 256 }
  0x77   : > { %p668_p2 = scmp.lt.s32.totalorder %s966_s7, %s666_s11  ;;  %p669_p9 = scmp.lt.s32.totalorder %s667_s22, %s661_s5 }
  0x78   : > { %p664_p1 = pneg %p663_p12 }
  0x79   : > { %p670_p11 = por %p669_p9, %p668_p2 }
  0x7b   : > { %p671_p3 = pnand %p670_p11, %p664_p1 }
  0x7d   : > { %674 = shalt.err (!%p671_p3)
}
  0x7e   : > { %s675_s23 = scalar_lea.hbm %s964_s19, 128  ;;  %s679_s30 = scalar_lea.hbm %s1040_s3, 256 }
  0x7f   : > { %p676_p6 = scmp.ne.s32.totalorder %s964_s19, %s675_s23  ;;  %p680_p0 = scmp.lt.u32.totalorder %s964_s19, %s1040_s3 }
  0x80   : > { %p681_p7 = scmp.lt.u32.totalorder %s679_s30, %s675_s23  ;;  %p683_p10 = scmp.lt.u32.totalorder %s675_s23, %s964_s19 }
  0x81   : > { %p677_p13 = pnand %p676_p6, %p1053_p5 }
  0x82   : > { %p682_p4 = por %p681_p7, %p680_p0 }
  0x83   : > { %p678_p8 = pneg %p677_p13 }
  0x84   : > { %p684_p12 = por %p683_p10, %p682_p4 }
  0x86   : > { %p685_p1 = pnand %p684_p12, %p678_p8 }
  0x88   : > { %688 = shalt.err (!%p685_p1)
}
  0x89   : > { %505 = dma.vmem_to_hbm [thread:$0]  (%p1053_p5), %s966_s7, 128, %s964_s19, %s313_s10  }
  0x8a PF: > { %s353_s4 = sand.u32 1, %s731_s12   ;;  %p1054_p2 = scmp.ne.s32.totalorder %s1046_s27, 0 }
  0x8b   : > { %p1055_p9 = scmp.ge.s32.totalorder %s751_s17, 2  ;;  %s354_s24 = scalar_lea.sflag [#allocation4], %s353_s4 }
  0x8d   : > { %p516_p11 = pnand %p1055_p9, %p1054_p2 }
  0x8f   : > { %722 = dma.done.wait (!%p516_p11), %s354_s24, 128  }
  0x90   : > { %724 = vsyncadd (!%p516_p11), %s354_s24, 4294967168  ;;  %s363_s18 = scalar_lea.sflag [#allocation9], %s353_s4 }
  0x91   : > { %726 = dma.done.wait (!%p516_p11), %s363_s18, 128  }
  0x92   : > { %728 = vsyncadd (!%p516_p11), %s363_s18, 4294967168  ;;  %s26_s17 = sadd.s32 1, %s751_s17   ;;  %s1056_s12 = smov %s735_s13 }
  0x93   : > { %p23_p3 = scmp.ge.s32.totalorder %s26_s17, 4   ;;  %s1057_s13 = smov %s739_s14 }
  0x94   : > { %s1058_s14 = smov %s834_s26  ;;  %s1059_s15 = smov %s747_s16 }
  0x95   : > { %s1060_s16 = smov %s1062_s20  ;;  %25 = sbr.rel (!%p23_p3) target bundleno = 10 (0xa), region = 107 }
  0x9c   :  { %368 = vsyncpa [#allocation3], 1 }
  0x9d   :  { %370 = vsyncpa [#allocation3 + $0x1], 1 }
  0x9e   :  { %371 = vsyncpa [#allocation6], 1 }
  0x9f   :  { %373 = vsyncpa [#allocation6 + $0x1], 1 }
  0xa0   :  { %374 = vsyncpa [#allocation4], 1 }
  0xa1   :  { %376 = vsyncpa [#allocation4 + $0x1], 1 }
  0xa2   :  { %377 = vsyncpa [#allocation9], 1 }
  0xa3   :  { %379 = vsyncpa [#allocation9 + $0x1], 1 }

</bundles_post_ra>
